<compile_context>
chip_gen: v5e
topology: v5e:2x2
jax: 0.10.0
libtpu: 0.0.40
codegen_flags: <defaults>
</compile_context>

<pallas_src>
import math
import functools

import jax
import jax.numpy as jnp
from jax.experimental import pallas as pl
from jax.experimental.pallas import tpu as pltpu


def _mha_kernel(xq_ref, xkv_ref, wq_ref, bq_ref, wkv_ref, bkv_ref,
                gamma_ref, beta_ref, o_ref,
                q_scr, m_scr, l_scr, acc_scr, *, n_head: int, eps: float):
    """One (batch, q-tile, kv-tile) grid step.

    xq_ref:  (tq, D)  x rows for this q tile (batch dim squeezed)
    xkv_ref: (tk, D)  x rows for this kv tile
    wq_ref:  (D, D)   pre-transposed, pre-scaled Q weight  (q = x @ Wq_t + bq)
    wkv_ref: (D, 2D)  pre-transposed fused [Wk | Wv] weight
    q_scr:   (H, tq, h)  query for this q tile, persists across the kv axis
    m/l_scr: (H, tq, 1)  online-softmax running max / row-sum
    acc_scr: (H, tq, h)  unnormalized context accumulator
    """
    ki = pl.program_id(2)
    nk = pl.num_programs(2)

    tq, D = xq_ref.shape
    tk = xkv_ref.shape[0]
    h_dim = D // n_head

    # ---- q-tile init: Q projection (softmax scale already folded in) --------
    @pl.when(ki == 0)
    def _():
        q = jnp.dot(xq_ref[...], wq_ref[...],
                    preferred_element_type=jnp.float32) + bq_ref[0]
        q_scr[...] = q.reshape(tq, n_head, h_dim).transpose(1, 0, 2).astype(q_scr.dtype)
        m_scr[...] = jnp.full(m_scr.shape, -jnp.inf, dtype=m_scr.dtype)
        l_scr[...] = jnp.zeros(l_scr.shape, dtype=l_scr.dtype)
        acc_scr[...] = jnp.zeros(acc_scr.shape, dtype=acc_scr.dtype)

    # ---- fused K/V projection for this kv tile (single MXU pass, N = 2D) ----
    kv = jnp.dot(xkv_ref[...], wkv_ref[...],
                 preferred_element_type=jnp.float32) + bkv_ref[0]        # (tk, 2D)
    k = kv[:, :D].reshape(tk, n_head, h_dim).transpose(1, 0, 2)          # (H, tk, h)
    v = kv[:, D:].reshape(tk, n_head, h_dim).transpose(1, 0, 2)          # (H, tk, h)
    k = k.astype(q_scr.dtype)
    v = v.astype(q_scr.dtype)

    # ---- head-batched scores + online softmax --------------------------------
    q = q_scr[...]                                                        # (H, tq, h)
    s = jnp.einsum('hqd,hkd->hqk', q, k,
                   preferred_element_type=jnp.float32)                    # (H, tq, tk)
    m_prev = m_scr[...]
    m_new = jnp.maximum(m_prev, s.max(axis=-1, keepdims=True))
    alpha = jnp.exp(m_prev - m_new)
    p = jnp.exp(s - m_new)
    l_scr[...] = alpha * l_scr[...] + p.sum(axis=-1, keepdims=True)
    acc_scr[...] = alpha * acc_scr[...] + jnp.einsum(
        'hqk,hkd->hqd', p.astype(v.dtype), v, preferred_element_type=jnp.float32)
    m_scr[...] = m_new

    # ---- finalize: normalize, merge heads, residual, LayerNorm ---------------
    @pl.when(ki == nk - 1)
    def _():
        inv_l = pl.reciprocal(l_scr[...], approx=True)                    # EUP, not VALU
        ctx = acc_scr[...] * inv_l                                        # (H, tq, h)
        ctx = ctx.transpose(1, 0, 2).reshape(tq, D)                       # (tq, D)
        y = ctx + xq_ref[...].astype(jnp.float32)
        mean = jnp.mean(y, axis=-1, keepdims=True)
        var = jnp.mean((y - mean) ** 2, axis=-1, keepdims=True)
        y = (y - mean) * jax.lax.rsqrt(var + eps)
        o_ref[...] = (y * gamma_ref[0] + beta_ref[0]).astype(o_ref.dtype)


def multi_head_attn(x, params, n_head, eps=1e-5, *, mxu_dtype=jnp.float32,
                    block_q=None, block_kv=None):
    B, S, D = x.shape
    wq, bq, wk, bk, wv, bv, gamma, beta = params
    h_dim = D // n_head
    assert h_dim * n_head == D

    tq = block_q or min(S, 256)
    tk = block_kv or min(S, 256)
    assert S % tq == 0 and S % tk == 0, "S must be divisible by the tile sizes"

    f32 = jnp.float32
    scale = 1.0 / math.sqrt(h_dim)

    # Host-side (one-time, free) weight prep:
    #   * transpose to [in, out] so the kernel never materializes W.T on-chip
    #   * fold the 1/sqrt(h_dim) softmax scale into the Q projection (and bias)
    #   * fuse K and V into one (D, 2D) weight
    wq_t = (wq.T * scale).astype(mxu_dtype)                      # (D, D)
    bq_s = (bq * scale).astype(f32).reshape(1, D)
    wkv_t = jnp.concatenate([wk.T, wv.T], axis=1).astype(mxu_dtype)   # (D, 2D)
    bkv = jnp.concatenate([bk, bv]).astype(f32).reshape(1, 2 * D)
    gamma2 = gamma.astype(f32).reshape(1, D)
    beta2 = beta.astype(f32).reshape(1, D)

    x_in = x.astype(mxu_dtype)

    kernel = functools.partial(_mha_kernel, n_head=n_head, eps=eps)
    grid = (B, S // tq, S // tk)

    return pl.pallas_call(
        kernel,
        out_shape=jax.ShapeDtypeStruct((B, S, D), x.dtype),
        grid_spec=pltpu.PrefetchScalarGridSpec(
            num_scalar_prefetch=0,
            grid=grid,
            in_specs=[
                # x rows for the q tile (leading batch dim squeezed out)
                pl.BlockSpec((None, tq, D), lambda b, qi, ki: (b, qi, 0)),
                # x rows for the kv tile
                pl.BlockSpec((None, tk, D), lambda b, qi, ki: (b, ki, 0)),
                pl.BlockSpec((D, D), lambda b, qi, ki: (0, 0)),          # Wq^T * scale
                pl.BlockSpec((1, D), lambda b, qi, ki: (0, 0)),          # bq * scale
                pl.BlockSpec((D, 2 * D), lambda b, qi, ki: (0, 0)),      # [Wk^T | Wv^T]
                pl.BlockSpec((1, 2 * D), lambda b, qi, ki: (0, 0)),      # [bk | bv]
                pl.BlockSpec((1, D), lambda b, qi, ki: (0, 0)),          # gamma
                pl.BlockSpec((1, D), lambda b, qi, ki: (0, 0)),          # beta
            ],
            out_specs=pl.BlockSpec((None, tq, D), lambda b, qi, ki: (b, qi, 0)),
            scratch_shapes=[
                pltpu.VMEM((n_head, tq, h_dim), mxu_dtype),    # q (per q tile)
                pltpu.VMEM((n_head, tq, 1), jnp.float32),      # m (running max)
                pltpu.VMEM((n_head, tq, 1), jnp.float32),      # l (running sum)
                pltpu.VMEM((n_head, tq, h_dim), jnp.float32),  # acc (context)
            ],
        ),
        compiler_params=pltpu.CompilerParams(
            dimension_semantics=("parallel", "parallel", "arbitrary")),
    )(x_in, x_in, wq_t, bq_s, wkv_t, bkv, gamma2, beta2)


def _reference(x, params, n_head, eps=1e-5):
    """Pure-JAX reference matching the PyTorch forward (eval mode)."""
    wq, bq, wk, bk, wv, bv, gamma, beta = params
    B, S, D = x.shape
    h = D // n_head

    def proj(w, b):
        y = x @ w.T + b
        return y.reshape(B, S, n_head, h).transpose(0, 2, 1, 3)  # (B,H,S,h)

    Q, K, V = proj(wq, bq), proj(wk, bk), proj(wv, bv)
    attn = jnp.einsum('bhqd,bhkd->bhqk', Q, K) / jnp.sqrt(h)
    attn = jax.nn.softmax(attn, axis=-1)
    ctx = jnp.einsum('bhqk,bhkd->bhqd', attn, V)
    ctx = ctx.transpose(0, 2, 1, 3).reshape(B, S, D)
    y = ctx + x
    mean = jnp.mean(y, axis=-1, keepdims=True)
    var = jnp.mean((y - mean) ** 2, axis=-1, keepdims=True)
    return (y - mean) / jnp.sqrt(var + eps) * gamma + beta


if __name__ == "__main__":
    B, S, D = 2, 8, 32
    n_head = 4

    key = jax.random.PRNGKey(0)
    kx, kq, kk, kv, kbq, kbk, kbv = jax.random.split(key, 7)

    x = jax.random.normal(kx, (B, S, D), dtype=jnp.float32)

    bound = 1.0 / math.sqrt(D)  # PyTorch nn.Linear default init range
    wq = jax.random.uniform(kq, (D, D), jnp.float32, -bound, bound)
    wk = jax.random.uniform(kk, (D, D), jnp.float32, -bound, bound)
    wv = jax.random.uniform(kv, (D, D), jnp.float32, -bound, bound)
    bq = jax.random.uniform(kbq, (D,), jnp.float32, -bound, bound)
    bk = jax.random.uniform(kbk, (D,), jnp.float32, -bound, bound)
    bv = jax.random.uniform(kbv, (D,), jnp.float32, -bound, bound)
    gamma = jnp.ones((D,), jnp.float32)
    beta = jnp.zeros((D,), jnp.float32)

    params = (wq, bq, wk, bk, wv, bv, gamma, beta)
    ref = _reference(x, params, n_head)

    # f32 MXU path (v5e-friendly).  Tolerance slightly looser than 1e-4 because
    # of the approx (EUP) reciprocal in the softmax and different matmul order.
    out = multi_head_attn(x, params, n_head)
    out = jax.block_until_ready(out)
    assert out.shape == (B, S, D)
    assert jnp.allclose(out, ref, atol=5e-3, rtol=5e-3), "f32 kernel mismatch"

    # bf16-for-MXU path (v6e/v7x): matmul inputs bf16, stats/LN in f32.
    out_bf16 = multi_head_attn(x, params, n_head, mxu_dtype=jnp.bfloat16)
    out_bf16 = jax.block_until_ready(out_bf16)
    assert jnp.allclose(out_bf16, ref, atol=5e-2, rtol=5e-2), "bf16 kernel mismatch"

    print("KERNEL_OK")
</pallas_src>

<mosaic_0001>
module attributes {stable_mosaic.version = 11 : i64} {
  func.func @_mha_kernel(%arg0: i32, %arg1: i32, %arg2: i32, %arg3: memref<1x8x32xf32, #tpu.memory_space<vmem>>, %arg4: memref<1x8x32xf32, #tpu.memory_space<vmem>>, %arg5: memref<32x32xf32, #tpu.memory_space<vmem>>, %arg6: memref<1x32xf32, #tpu.memory_space<vmem>>, %arg7: memref<32x64xf32, #tpu.memory_space<vmem>>, %arg8: memref<1x64xf32, #tpu.memory_space<vmem>>, %arg9: memref<1x32xf32, #tpu.memory_space<vmem>>, %arg10: memref<1x32xf32, #tpu.memory_space<vmem>>, %arg11: memref<1x8x32xf32, #tpu.memory_space<vmem>>, %arg12: memref<4x8x8xf32, #tpu.memory_space<vmem>>, %arg13: memref<4x8x1xf32, #tpu.memory_space<vmem>>, %arg14: memref<4x8x1xf32, #tpu.memory_space<vmem>>, %arg15: memref<4x8x8xf32, #tpu.memory_space<vmem>>) attributes {dimension_semantics = [#tpu.dimension_semantics<parallel>, #tpu.dimension_semantics<parallel>, #tpu.dimension_semantics<arbitrary>], iteration_bounds = array<i64: 2, 1, 1>, scalar_prefetch = 0 : i64, scratch_operands = 4 : i64, tpu.core_type = #tpu.core_type<tc>, window_params = [{transform_indices = @transform_0, window_bounds = array<i64: 1, 8, 32>}, {transform_indices = @transform_1, window_bounds = array<i64: 1, 8, 32>}, {pipeline_mode = #tpu.pipeline_mode<synchronous>, transform_indices = @transform_2, window_bounds = array<i64: 32, 32>}, {pipeline_mode = #tpu.pipeline_mode<synchronous>, transform_indices = @transform_3, window_bounds = array<i64: 1, 32>}, {pipeline_mode = #tpu.pipeline_mode<synchronous>, transform_indices = @transform_4, window_bounds = array<i64: 32, 64>}, {pipeline_mode = #tpu.pipeline_mode<synchronous>, transform_indices = @transform_5, window_bounds = array<i64: 1, 64>}, {pipeline_mode = #tpu.pipeline_mode<synchronous>, transform_indices = @transform_6, window_bounds = array<i64: 1, 32>}, {pipeline_mode = #tpu.pipeline_mode<synchronous>, transform_indices = @transform_7, window_bounds = array<i64: 1, 32>}, {transform_indices = @transform_8, window_bounds = array<i64: 1, 8, 32>}]} {
    %c0_i32 = arith.constant 0 : i32
    %0 = arith.cmpi eq, %arg2, %c0_i32 : i32
    %1 = arith.extui %0 : i1 to i32
    %c0_i32_0 = arith.constant 0 : i32
    %2 = arith.cmpi ne, %1, %c0_i32_0 : i32
    scf.if %2 {
      %c0_34 = arith.constant 0 : index
      %c0_35 = arith.constant 0 : index
      %c0_36 = arith.constant 0 : index
      %45 = vector.load %arg3[%c0_34, %c0_35, %c0_36] : memref<1x8x32xf32, #tpu.memory_space<vmem>>, vector<1x8x32xf32>
      %46 = vector.shape_cast %45 : vector<1x8x32xf32> to vector<8x32xf32>
      %c0_37 = arith.constant 0 : index
      %c0_38 = arith.constant 0 : index
      %47 = vector.load %arg5[%c0_37, %c0_38] : memref<32x32xf32, #tpu.memory_space<vmem>>, vector<32x32xf32>
      %cst_39 = arith.constant dense<0.000000e+00> : vector<8x32xf32>
      %48 = tpu.matmul %46, %47, %cst_39 {dimension_numbers = #tpu.dot_dimension_numbers<[1], [0], [0], [1], [0, 0, 1, 1], [], []>} : vector<8x32xf32>, vector<32x32xf32>, vector<8x32xf32> -> vector<8x32xf32>
      %c0_40 = arith.constant 0 : index
      %c0_41 = arith.constant 0 : index
      %49 = vector.load %arg6[%c0_40, %c0_41] : memref<1x32xf32, #tpu.memory_space<vmem>>, vector<1x32xf32>
      %50 = vector.shape_cast %49 : vector<1x32xf32> to vector<32xf32>
      %51 = vector.shape_cast %50 : vector<32xf32> to vector<1x32xf32>
      %52 = vector.broadcast %51 : vector<1x32xf32> to vector<8x32xf32>
      %53 = arith.addf %48, %52 : vector<8x32xf32>
      %54 = vector.shape_cast %53 : vector<8x32xf32> to vector<8x4x8xf32>
      %55 = tpu.transpose %54, [1, 0, 2] : vector<8x4x8xf32> -> vector<4x8x8xf32>
      %c0_42 = arith.constant 0 : index
      %c0_43 = arith.constant 0 : index
      %c0_44 = arith.constant 0 : index
      %56 = vector.load %arg12[%c0_42, %c0_43, %c0_44] : memref<4x8x8xf32, #tpu.memory_space<vmem>>, vector<4x8x8xf32>
      tpu.vector_store %arg12[%c0_42, %c0_43, %c0_44], %55 {strides = array<i32>} : memref<4x8x8xf32, #tpu.memory_space<vmem>>, vector<4x8x8xf32>,
      %cst_45 = arith.constant 0xFF800000 : f32
      %57 = vector.broadcast %cst_45 : f32 to vector<4x8x1xf32>
      %c0_46 = arith.constant 0 : index
      %c0_47 = arith.constant 0 : index
      %c0_48 = arith.constant 0 : index
      %58 = vector.load %arg13[%c0_46, %c0_47, %c0_48] : memref<4x8x1xf32, #tpu.memory_space<vmem>>, vector<4x8x1xf32>
      tpu.vector_store %arg13[%c0_46, %c0_47, %c0_48], %57 {strides = array<i32>} : memref<4x8x1xf32, #tpu.memory_space<vmem>>, vector<4x8x1xf32>,
      %cst_49 = arith.constant 0.000000e+00 : f32
      %59 = vector.broadcast %cst_49 : f32 to vector<4x8x1xf32>
      %c0_50 = arith.constant 0 : index
      %c0_51 = arith.constant 0 : index
      %c0_52 = arith.constant 0 : index
      %60 = vector.load %arg14[%c0_50, %c0_51, %c0_52] : memref<4x8x1xf32, #tpu.memory_space<vmem>>, vector<4x8x1xf32>
      tpu.vector_store %arg14[%c0_50, %c0_51, %c0_52], %59 {strides = array<i32>} : memref<4x8x1xf32, #tpu.memory_space<vmem>>, vector<4x8x1xf32>,
      %cst_53 = arith.constant 0.000000e+00 : f32
      %61 = vector.broadcast %cst_53 : f32 to vector<4x8x8xf32>
      %c0_54 = arith.constant 0 : index
      %c0_55 = arith.constant 0 : index
      %c0_56 = arith.constant 0 : index
      %62 = vector.load %arg15[%c0_54, %c0_55, %c0_56] : memref<4x8x8xf32, #tpu.memory_space<vmem>>, vector<4x8x8xf32>
      tpu.vector_store %arg15[%c0_54, %c0_55, %c0_56], %61 {strides = array<i32>} : memref<4x8x8xf32, #tpu.memory_space<vmem>>, vector<4x8x8xf32>,
    } else {
    }
    %c0 = arith.constant 0 : index
    %c0_1 = arith.constant 0 : index
    %c0_2 = arith.constant 0 : index
    %3 = vector.load %arg4[%c0, %c0_1, %c0_2] : memref<1x8x32xf32, #tpu.memory_space<vmem>>, vector<1x8x32xf32>
    %4 = vector.shape_cast %3 : vector<1x8x32xf32> to vector<8x32xf32>
    %c0_3 = arith.constant 0 : index
    %c0_4 = arith.constant 0 : index
    %5 = vector.load %arg7[%c0_3, %c0_4] : memref<32x64xf32, #tpu.memory_space<vmem>>, vector<32x64xf32>
    %cst = arith.constant dense<0.000000e+00> : vector<8x64xf32>
    %6 = tpu.matmul %4, %5, %cst {dimension_numbers = #tpu.dot_dimension_numbers<[1], [0], [0], [1], [0, 0, 1, 1], [], []>} : vector<8x32xf32>, vector<32x64xf32>, vector<8x64xf32> -> vector<8x64xf32>
    %c0_5 = arith.constant 0 : index
    %c0_6 = arith.constant 0 : index
    %7 = vector.load %arg8[%c0_5, %c0_6] : memref<1x64xf32, #tpu.memory_space<vmem>>, vector<1x64xf32>
    %8 = vector.shape_cast %7 : vector<1x64xf32> to vector<64xf32>
    %9 = vector.shape_cast %8 : vector<64xf32> to vector<1x64xf32>
    %10 = vector.broadcast %9 : vector<1x64xf32> to vector<8x64xf32>
    %11 = arith.addf %6, %10 : vector<8x64xf32>
    %12 = vector.extract_strided_slice %11 {offsets = [0, 0], sizes = [8, 32], strides = [1, 1]} : vector<8x64xf32> to vector<8x32xf32>
    %13 = vector.shape_cast %12 : vector<8x32xf32> to vector<8x4x8xf32>
    %14 = tpu.transpose %13, [1, 0, 2] : vector<8x4x8xf32> -> vector<4x8x8xf32>
    %15 = vector.extract_strided_slice %11 {offsets = [0, 32], sizes = [8, 32], strides = [1, 1]} : vector<8x64xf32> to vector<8x32xf32>
    %16 = vector.shape_cast %15 : vector<8x32xf32> to vector<8x4x8xf32>
    %17 = tpu.transpose %16, [1, 0, 2] : vector<8x4x8xf32> -> vector<4x8x8xf32>
    %c0_7 = arith.constant 0 : index
    %c0_8 = arith.constant 0 : index
    %c0_9 = arith.constant 0 : index
    %18 = vector.load %arg12[%c0_7, %c0_8, %c0_9] : memref<4x8x8xf32, #tpu.memory_space<vmem>>, vector<4x8x8xf32>
    "tpu.trace_start"() <{level = 10 : i32, message = "hqd,hkd->hqk"}> : () -> ()
    %cst_10 = arith.constant dense<0.000000e+00> : vector<4x8x8xf32>
    %19 = tpu.matmul %18, %14, %cst_10 {dimension_numbers = #tpu.dot_dimension_numbers<[2], [2], [1], [1], [0, 0, 0, 1, 1, 1], [0], [0]>} : vector<4x8x8xf32>, vector<4x8x8xf32>, vector<4x8x8xf32> -> vector<4x8x8xf32>
    "tpu.trace_stop"() : () -> ()
    %c0_11 = arith.constant 0 : index
    %c0_12 = arith.constant 0 : index
    %c0_13 = arith.constant 0 : index
    %20 = vector.load %arg13[%c0_11, %c0_12, %c0_13] : memref<4x8x1xf32, #tpu.memory_space<vmem>>, vector<4x8x1xf32>
    %cst_14 = arith.constant dense<0xFF800000> : vector<4x8xf32>
    %21 = vector.multi_reduction <maximumf>, %19, %cst_14 [2] : vector<4x8x8xf32> to vector<4x8xf32>
    %22 = vector.shape_cast %21 : vector<4x8xf32> to vector<4x8x1xf32>
    %23 = arith.maximumf %20, %22 : vector<4x8x1xf32>
    %24 = arith.subf %20, %23 : vector<4x8x1xf32>
    %25 = math.exp %24 : vector<4x8x1xf32>
    %26 = vector.broadcast %23 : vector<4x8x1xf32> to vector<4x8x8xf32>
    %27 = arith.subf %19, %26 : vector<4x8x8xf32>
    %28 = math.exp %27 : vector<4x8x8xf32>
    %c0_15 = arith.constant 0 : index
    %c0_16 = arith.constant 0 : index
    %c0_17 = arith.constant 0 : index
    %29 = vector.load %arg14[%c0_15, %c0_16, %c0_17] : memref<4x8x1xf32, #tpu.memory_space<vmem>>, vector<4x8x1xf32>
    %30 = arith.mulf %25, %29 : vector<4x8x1xf32>
    %cst_18 = arith.constant dense<0.000000e+00> : vector<4x8xf32>
    %31 = vector.multi_reduction <add>, %28, %cst_18 [2] : vector<4x8x8xf32> to vector<4x8xf32>
    %32 = vector.shape_cast %31 : vector<4x8xf32> to vector<4x8x1xf32>
    %33 = arith.addf %30, %32 : vector<4x8x1xf32>
    %c0_19 = arith.constant 0 : index
    %c0_20 = arith.constant 0 : index
    %c0_21 = arith.constant 0 : index
    %34 = vector.load %arg14[%c0_19, %c0_20, %c0_21] : memref<4x8x1xf32, #tpu.memory_space<vmem>>, vector<4x8x1xf32>
    tpu.vector_store %arg14[%c0_19, %c0_20, %c0_21], %33 {strides = array<i32>} : memref<4x8x1xf32, #tpu.memory_space<vmem>>, vector<4x8x1xf32>,
    %c0_22 = arith.constant 0 : index
    %c0_23 = arith.constant 0 : index
    %c0_24 = arith.constant 0 : index
    %35 = vector.load %arg15[%c0_22, %c0_23, %c0_24] : memref<4x8x8xf32, #tpu.memory_space<vmem>>, vector<4x8x8xf32>
    %36 = vector.broadcast %25 : vector<4x8x1xf32> to vector<4x8x8xf32>
    %37 = arith.mulf %36, %35 : vector<4x8x8xf32>
    "tpu.trace_start"() <{level = 10 : i32, message = "hqk,hkd->hqd"}> : () -> ()
    %cst_25 = arith.constant dense<0.000000e+00> : vector<4x8x8xf32>
    %38 = tpu.matmul %28, %17, %cst_25 {dimension_numbers = #tpu.dot_dimension_numbers<[2], [1], [1], [2], [0, 0, 0, 1, 1, 2], [0], [0]>} : vector<4x8x8xf32>, vector<4x8x8xf32>, vector<4x8x8xf32> -> vector<4x8x8xf32>
    "tpu.trace_stop"() : () -> ()
    %39 = arith.addf %37, %38 : vector<4x8x8xf32>
    %c0_26 = arith.constant 0 : index
    %c0_27 = arith.constant 0 : index
    %c0_28 = arith.constant 0 : index
    %40 = vector.load %arg15[%c0_26, %c0_27, %c0_28] : memref<4x8x8xf32, #tpu.memory_space<vmem>>, vector<4x8x8xf32>
    tpu.vector_store %arg15[%c0_26, %c0_27, %c0_28], %39 {strides = array<i32>} : memref<4x8x8xf32, #tpu.memory_space<vmem>>, vector<4x8x8xf32>,
    %c0_29 = arith.constant 0 : index
    %c0_30 = arith.constant 0 : index
    %c0_31 = arith.constant 0 : index
    %41 = vector.load %arg13[%c0_29, %c0_30, %c0_31] : memref<4x8x1xf32, #tpu.memory_space<vmem>>, vector<4x8x1xf32>
    tpu.vector_store %arg13[%c0_29, %c0_30, %c0_31], %23 {strides = array<i32>} : memref<4x8x1xf32, #tpu.memory_space<vmem>>, vector<4x8x1xf32>,
    %c0_i32_32 = arith.constant 0 : i32
    %42 = arith.cmpi eq, %arg2, %c0_i32_32 : i32
    %43 = arith.extui %42 : i1 to i32
    %c0_i32_33 = arith.constant 0 : i32
    %44 = arith.cmpi ne, %43, %c0_i32_33 : i32
    scf.if %44 {
      %c0_34 = arith.constant 0 : index
      %c0_35 = arith.constant 0 : index
      %c0_36 = arith.constant 0 : index
      %45 = vector.load %arg14[%c0_34, %c0_35, %c0_36] : memref<4x8x1xf32, #tpu.memory_space<vmem>>, vector<4x8x1xf32>
      %46 = tpu.reciprocal %45 {approx = true} : vector<4x8x1xf32> -> vector<4x8x1xf32>
      %c0_37 = arith.constant 0 : index
      %c0_38 = arith.constant 0 : index
      %c0_39 = arith.constant 0 : index
      %47 = vector.load %arg15[%c0_37, %c0_38, %c0_39] : memref<4x8x8xf32, #tpu.memory_space<vmem>>, vector<4x8x8xf32>
      %48 = vector.broadcast %46 : vector<4x8x1xf32> to vector<4x8x8xf32>
      %49 = arith.mulf %47, %48 : vector<4x8x8xf32>
      %50 = tpu.transpose %49, [1, 0, 2] : vector<4x8x8xf32> -> vector<8x4x8xf32>
      %51 = vector.shape_cast %50 : vector<8x4x8xf32> to vector<8x32xf32>
      %c0_40 = arith.constant 0 : index
      %c0_41 = arith.constant 0 : index
      %c0_42 = arith.constant 0 : index
      %52 = vector.load %arg3[%c0_40, %c0_41, %c0_42] : memref<1x8x32xf32, #tpu.memory_space<vmem>>, vector<1x8x32xf32>
      %53 = vector.shape_cast %52 : vector<1x8x32xf32> to vector<8x32xf32>
      %54 = arith.addf %51, %53 : vector<8x32xf32>
      %cst_43 = arith.constant dense<0.000000e+00> : vector<8xf32>
      %55 = vector.multi_reduction <add>, %54, %cst_43 [1] : vector<8x32xf32> to vector<8xf32>
      %56 = vector.shape_cast %55 : vector<8xf32> to vector<8x1xf32>
      %cst_44 = arith.constant 3.200000e+01 : f32
      %57 = vector.broadcast %cst_44 : f32 to vector<8x1xf32>
      %58 = arith.divf %56, %57 : vector<8x1xf32>
      %59 = vector.broadcast %58 : vector<8x1xf32> to vector<8x32xf32>
      %60 = arith.subf %54, %59 : vector<8x32xf32>
      %61 = arith.mulf %60, %60 : vector<8x32xf32>
      %cst_45 = arith.constant dense<0.000000e+00> : vector<8xf32>
      %62 = vector.multi_reduction <add>, %61, %cst_45 [1] : vector<8x32xf32> to vector<8xf32>
      %63 = vector.shape_cast %62 : vector<8xf32> to vector<8x1xf32>
      %cst_46 = arith.constant 3.200000e+01 : f32
      %64 = vector.broadcast %cst_46 : f32 to vector<8x1xf32>
      %65 = arith.divf %63, %64 : vector<8x1xf32>
      %66 = vector.broadcast %58 : vector<8x1xf32> to vector<8x32xf32>
      %67 = arith.subf %54, %66 : vector<8x32xf32>
      %cst_47 = arith.constant 9.99999974E-6 : f32
      %68 = vector.broadcast %cst_47 : f32 to vector<8x1xf32>
      %69 = arith.addf %65, %68 : vector<8x1xf32>
      %70 = math.rsqrt %69 : vector<8x1xf32>
      %71 = vector.broadcast %70 : vector<8x1xf32> to vector<8x32xf32>
      %72 = arith.mulf %67, %71 : vector<8x32xf32>
      %c0_48 = arith.constant 0 : index
      %c0_49 = arith.constant 0 : index
      %73 = vector.load %arg9[%c0_48, %c0_49] : memref<1x32xf32, #tpu.memory_space<vmem>>, vector<1x32xf32>
      %74 = vector.shape_cast %73 : vector<1x32xf32> to vector<32xf32>
      %75 = vector.shape_cast %74 : vector<32xf32> to vector<1x32xf32>
      %76 = vector.broadcast %75 : vector<1x32xf32> to vector<8x32xf32>
      %77 = arith.mulf %72, %76 : vector<8x32xf32>
      %c0_50 = arith.constant 0 : index
      %c0_51 = arith.constant 0 : index
      %78 = vector.load %arg10[%c0_50, %c0_51] : memref<1x32xf32, #tpu.memory_space<vmem>>, vector<1x32xf32>
      %79 = vector.shape_cast %78 : vector<1x32xf32> to vector<32xf32>
      %80 = vector.shape_cast %79 : vector<32xf32> to vector<1x32xf32>
      %81 = vector.broadcast %80 : vector<1x32xf32> to vector<8x32xf32>
      %82 = arith.addf %77, %81 : vector<8x32xf32>
      %c0_52 = arith.constant 0 : index
      %c0_53 = arith.constant 0 : index
      %c0_54 = arith.constant 0 : index
      %83 = vector.load %arg11[%c0_52, %c0_53, %c0_54] : memref<1x8x32xf32, #tpu.memory_space<vmem>>, vector<1x8x32xf32>
      %84 = vector.shape_cast %83 : vector<1x8x32xf32> to vector<8x32xf32>
      %85 = vector.shape_cast %82 : vector<8x32xf32> to vector<1x8x32xf32>
      tpu.vector_store %arg11[%c0_52, %c0_53, %c0_54], %85 {strides = array<i32>} : memref<1x8x32xf32, #tpu.memory_space<vmem>>, vector<1x8x32xf32>,
    } else {
    }
    return
  }
  func.func @transform_0(%arg0: i32, %arg1: i32, %arg2: i32) -> (i32, i32, i32) {
    %c0_i32 = arith.constant 0 : i32
    %c0_i32_0 = arith.constant 0 : i32
    return %arg0, %arg1, %c0_i32 : i32, i32, i32
  }
  func.func @transform_1(%arg0: i32, %arg1: i32, %arg2: i32) -> (i32, i32, i32) {
    %c0_i32 = arith.constant 0 : i32
    %c0_i32_0 = arith.constant 0 : i32
    return %arg0, %arg2, %c0_i32 : i32, i32, i32
  }
  func.func @transform_2(%arg0: i32, %arg1: i32, %arg2: i32) -> (i32, i32) {
    %c0_i32 = arith.constant 0 : i32
    %c0_i32_0 = arith.constant 0 : i32
    %c0_i32_1 = arith.constant 0 : i32
    return %c0_i32, %c0_i32_0 : i32, i32
  }
  func.func @transform_3(%arg0: i32, %arg1: i32, %arg2: i32) -> (i32, i32) {
    %c0_i32 = arith.constant 0 : i32
    %c0_i32_0 = arith.constant 0 : i32
    %c0_i32_1 = arith.constant 0 : i32
    return %c0_i32, %c0_i32_0 : i32, i32
  }
  func.func @transform_4(%arg0: i32, %arg1: i32, %arg2: i32) -> (i32, i32) {
    %c0_i32 = arith.constant 0 : i32
    %c0_i32_0 = arith.constant 0 : i32
    %c0_i32_1 = arith.constant 0 : i32
    return %c0_i32, %c0_i32_0 : i32, i32
  }
  func.func @transform_5(%arg0: i32, %arg1: i32, %arg2: i32) -> (i32, i32) {
    %c0_i32 = arith.constant 0 : i32
    %c0_i32_0 = arith.constant 0 : i32
    %c0_i32_1 = arith.constant 0 : i32
    return %c0_i32, %c0_i32_0 : i32, i32
  }
  func.func @transform_6(%arg0: i32, %arg1: i32, %arg2: i32) -> (i32, i32) {
    %c0_i32 = arith.constant 0 : i32
    %c0_i32_0 = arith.constant 0 : i32
    %c0_i32_1 = arith.constant 0 : i32
    return %c0_i32, %c0_i32_0 : i32, i32
  }
  func.func @transform_7(%arg0: i32, %arg1: i32, %arg2: i32) -> (i32, i32) {
    %c0_i32 = arith.constant 0 : i32
    %c0_i32_0 = arith.constant 0 : i32
    %c0_i32_1 = arith.constant 0 : i32
    return %c0_i32, %c0_i32_0 : i32, i32
  }
  func.func @transform_8(%arg0: i32, %arg1: i32, %arg2: i32) -> (i32, i32, i32) {
    %c0_i32 = arith.constant 0 : i32
    %c0_i32_0 = arith.constant 0 : i32
    return %arg0, %arg1, %c0_i32 : i32, i32, i32
  }
}

</mosaic_0001>

<bundles_post_ra>
// kernel: tpu_custom_call.1
= control target key start
LH: loop header
LB: loop body
LE: loop exit
PB: predicated region body
PF: predicated region fallthrough
CT: control target
= control target key end

     0   :  { %s2504_s0 = inlined_call_operand.hbm [shape: f32[2,8,32], index: 0, kind: input, shape index: {}]   ;;  %s2505_s1 = inlined_call_operand.hbm [shape: f32[2,8,32], index: 1, kind: input, shape index: {}]   ;;  %s2506_s2 = inlined_call_operand.hbm [shape: f32[32,32], index: 2, kind: input, shape index: {}]   ;;  %s2507_s3 = inlined_call_operand.vmem [shape: f32[1,32], index: 3, kind: input, shape index: {}]   ;;  %s2508_s4 = inlined_call_operand.hbm [shape: f32[32,64], index: 4, kind: input, shape index: {}]   ;;  %s2509_s5 = inlined_call_operand.vmem [shape: f32[1,64], index: 5, kind: input, shape index: {}]   ;;  %s2510_s6 = inlined_call_operand.vmem [shape: f32[1,32], index: 6, kind: input, shape index: {}]   ;;  %s2511_s7 = inlined_call_operand.vmem [shape: f32[1,32], index: 7, kind: input, shape index: {}]   ;;  %s2512_s8 = inlined_call_operand.hbm [shape: f32[2,8,32], index: 8, kind: output, shape index: {}]  }
   0x1   :  { %2518 = sst [smem:[#allocation26_spill]] %s2506_s2 }
   0x2   :  { %2519 = sst [smem:[#allocation27_spill]] %s2508_s4 }
   0x3   :  { %2520 = sst [smem:[#allocation28_spill]] %s2511_s7 }
   0x4   :  { %13 = vsyncpa [#allocation7], 0 }
   0x5   :  { %15 = vsyncpa [#allocation7 + $0x1], 0 }
   0x6   :  { %16 = vsyncpa [#allocation10], 0 }
   0x7   :  { %18 = vsyncpa [#allocation10 + $0x1], 0 }
   0x8   :  { %19 = vsyncpa [#allocation13], 0 }
   0x9   :  { %20 = vsyncpa [#allocation8], 0 }
   0xa   :  { %22 = vsyncpa [#allocation8 + $0x1], 0  ;;  %s2019_s27 = smov 0   ;;  %s2021_s28 = smov 0  }
   0xb   :  { %s2023_s29 = smov 0   ;;  %s2025_s30 = smov 0  }
   0xc   :  { %s2027_s9 = smov 0   ;;  %s2029_s10 = smov 0  }
   0xd LB: > { %2521 = sst [smem:[#allocation20_spill]] %s1935_s27  ;;  %s2050_s11 = sadd.s32 4294967295, %s1955_s10   ;;  %s1955_s10 = sphi %s2029_s10, %s28_s10   ;;  %s1951_s9 = sphi %s2027_s9, %s2540_s9   ;;  %s1947_s30 = sphi %s2025_s30, %s2539_s30   ;;  %s1943_s29 = sphi %s2023_s29, %s2538_s29   ;;  %s1939_s28 = sphi %s2021_s28, %s2542_s28   ;;  %s1935_s27 = sphi %s2019_s27, %s2541_s27  }
   0xe   : > { %2522 = sst [smem:[#allocation21_spill]] %s1943_s29  ;;  %p1561_p0 = scmp.ge.s32.totalorder %s1955_s10, 1 }
   0xf   : > { %2523 = sst [smem:[#allocation22_spill]] %s1951_s9  ;;  %p70_p1 = scmp.eq.s32.totalorder %s2050_s11, 0 }
  0x10   : > { %p262_p2 = scmp.lt.s32.totalorder %s1955_s10, 3  ;;  %s2524_s2 = sld [smem:[#allocation26_spill]] }
  0x11   : > { %s1957_s16 = smov [#allocation11]   ;;  %p1564_p6 = scmp.ge.s32.totalorder %s1955_s10, 2 }
  0x12   : > { %p2058_p3 = pnand %p1561_p0, %p262_p2  ;;  %s275_s17 = sshll.u32 %s1957_s16, 4  ;;  %s276_s17 = int_to_ptr.vmem [resolvable:$true] %s275_s17 }
  0x13   : > { %s2526_s4 = sld [smem:[#allocation27_spill]]  ;;  %s1958_s21 = smov 128  }
  0x14   : > { %p1607_p4 = pneg %p2058_p3  ;;  %s1959_s22 = smov 8  }
  0x15   : > { %s1960_s23 = smov [#allocation12]   ;;  %s1560_s25 = sadd.s32 4294967294, %s1955_s10  }
  0x16   : > { %s273_s14 = sshll.u32 %s2524_s2, 4  ;;  %p1608_p5 = pnand %p1607_p4, %p70_p1  ;;  %s274_s14 = int_to_ptr.hbm [resolvable:$true] %s273_s14 }
  0x17   : > { %s292_s24 = sshll.u32 %s1960_s23, 4  ;;  %s47_s26 = sadd.s32 1, %s1951_s9  ;;  %s293_s24 = int_to_ptr.vmem [resolvable:$true] %s292_s24 }
  0x18   : > { %1610 = dma.hbm_to_vmem [thread:$0]  (!%p1608_p5), %s274_s14, 512, %s276_s17, [#allocation10], %s1958_s21, %s1958_s21, %s1959_s22  }
  0x19   : > { %s290_s20 = sshll.u32 %s2526_s4, 4  ;;  %p49_p7 = scmp.ge.s32.totalorder %s47_s26, 2  ;;  %s291_s20 = int_to_ptr.hbm [resolvable:$true] %s290_s20 }
  0x1a   : > { %1613 = dma.hbm_to_vmem [thread:$0]  (!%p1608_p5), %s291_s20, 512, %s293_s24, [#allocation13], %s1958_s21, %s1958_s21, %s1959_s22  }
  0x1b   : > { %s56_s12 = sadd.s32 1, %s1943_s29  ;;  %p63_p8 = scmp.ne.s32.totalorder %s1943_s29, %s1939_s28 }
  0x1c   : > { %p64_p9 = scmp.eq.s32.totalorder %s1955_s10, 0  ;;  %s2544_s26 = smov (%p49_p7, %s47_s26), 0 }
  0x1d   : > { %2527 = sst [smem:[#allocation23_spill]] %s2544_s26  ;;  %p69_p11 = scmp.ne.s32.totalorder %s1939_s28, %s1935_s27 }
  0x1e   : > { %p2078_p10 = por %p64_p9, %p63_p8  ;;  %s51_s14 = ssub.s32 %s1951_s9, %s2544_s26 }
  0x1f   : > { %p249_p12 = scmp.eq.s32.totalorder %s2050_s11, 1  ;;  %p54_p13 = scmp.eq.s32.totalorder %s51_s14, 0 }
  0x20   : > { %p2089_p0 = por %p70_p1, %p69_p11  ;;  %p255_p4 = scmp.eq.s32.totalorder %s1560_s25, 1 }
  0x21   : > { %p2093_p2 = por %p249_p12, %p63_p8  ;;  %p1627_p7 = scmp.lt.s32.totalorder %s1955_s10, 2 }
  0x22   : > { %s2098_s18 = scalar_select %p54_p13, %s1943_s29, %s56_s12  }
  0x23   : > { %p2100_p5 = por %p255_p4, %p69_p11  ;;  %s315_s20 = sand.u32 1, %s1943_s29  }
  0x24   : > { %2531 = sst [smem:[#allocation24_spill]] %s2098_s18  ;;  %s1566_s21 = sshll.u32 %s1951_s9, 3 }
  0x25   : > { %s2532_s19 = scalar_select %p2100_p5, 1, 0 }
  0x26   : > { %s1565_s22 = sshll.u32 %s315_s20, 3  ;;  %s324_s14 = scalar_lea.hbm %s2504_s0, %s1566_s21 }
  0x27   : > { %2533 = sst [smem:[#allocation25_spill]] %s2532_s19  ;;  %s326_s2 = sshll.u32 %s324_s14, 4  ;;  %s327_s2 = int_to_ptr.hbm [resolvable:$true] %s326_s2 }
  0x28   : > { %s319_s4 = scalar_lea.vmem [#allocation6], %s1565_s22  ;;  %p1615_p8 = pnand %p1627_p7, %p2078_p10 }
  0x29   : > { %s328_s26 = sshll.u32 %s319_s4, 4  ;;  %s344_s18 = scalar_lea.hbm %s2505_s1, %s1566_s21  ;;  %s329_s26 = int_to_ptr.vmem [resolvable:$true] %s328_s26 }
  0x2a   : > { %s335_s19 = sand.u32 1, %s1955_s10   ;;  %s316_s27 = scalar_lea.sflag [#allocation7], %s315_s20 }
  0x2b   : > { %1617 = dma.hbm_to_vmem [thread:$0]  (!%p1615_p8), %s327_s2, 128, %s329_s26, %s316_s27  }
  0x2c   : > { %s346_s9 = sshll.u32 %s344_s18, 4  ;;  %s339_s29 = scalar_lea.vmem [#allocation9], %s1565_s22  ;;  %s347_s9 = int_to_ptr.hbm [resolvable:$true] %s346_s9 }
  0x2d   : > { %s348_s7 = sshll.u32 %s339_s29, 4  ;;  %s336_s23 = scalar_lea.sflag [#allocation10], %s335_s19  ;;  %s349_s7 = int_to_ptr.vmem [resolvable:$true] %s348_s7 }
  0x2e   : > { %1620 = dma.hbm_to_vmem [thread:$0]  (!%p1615_p8), %s347_s9, 128, %s349_s7, %s336_s23  }
  0x2f   : > { %357 = sbr.rel (%p2058_p3) target bundleno = 1406 (0x57e), region = 52  ;;  %s2119_s4 = sand.u32 (!%p2058_p3), 1, %s1939_s28  }
  0x30   : > { %s2122_s13 = sshll.u32 (!%p2058_p3), %s2119_s4, 3  ;;  %s360_s2 = scalar_lea.sflag (!%p2058_p3), [#allocation7], %s2119_s4 }
  0x31   : > { %s363_s27 = scalar_lea.vmem (!%p2058_p3), [#allocation6], %s2122_s13 }
  0x34   : > { %1914 = dma.done.wait (%p2089_p0), %s360_s2, 128  }
  0x35   : > { %1916 = vsyncadd (%p2089_p0), %s360_s2, 4294967168  ;;  %s369_s7 = sand.u32 1, %s2050_s11   ;;  %s373_s9 = scalar_lea.vmem [#allocation9], %s2122_s13 }
  0x36   : > { %s370_s29 = scalar_lea.sflag [#allocation10], %s369_s7 }
  0x37   : > { %1918 = dma.done.wait (%p2089_p0), %s370_s29, 128  }
  0x38   : > { %1920 = vsyncadd (%p2089_p0), %s370_s29, 4294967168 }
  0x39   : > { %1922 = dma.done.wait (%p70_p1), [#allocation10], 512  }
  0x3a   : > { %1924 = vsyncadd (%p70_p1), [#allocation10], 4294966784 }
  0x3b   : > { %1926 = dma.done.wait (%p70_p1), [#allocation13], 512  }
  0x3c   : > { %1928 = vsyncadd (%p70_p1), [#allocation13], 4294966784  ;;  %v430_v0 = vld [vmem:[#allocation11 + $0x18] sm:$0xff]  ;;  %v429_v2 = vld [vmem:[#allocation11 + $0x10] sm:$0xff]  ;;  %vm435_vm0 = vcmask 261120   ;;  %s1961_s18 = smov 112  }
  0x3d   : > { %v602_v1 = vld [vmem:[#allocation12 + $0x18] sm:$0xff]  ;;  %451 = vmatpush.msra.mxu0 %v430_v0  ;;  %v601_v3 = vld [vmem:[#allocation12 + $0x10] sm:$0xff]  ;;  %v428_v4 = vld [vmem:[#allocation11 + $0x8] sm:$0xff]  ;;  %s1962_s19 = smov 104   ;;  %s1963_s20 = smov 120   ;;  %vm470_vm1 = vcmask 1047556  }
  0x3e   : > { %623 = vmatpush.msra.mxu1 %v602_v1  ;;  %v600_v5 = vld [vmem:[#allocation12 + $0x8] sm:$0xff]  ;;  %v427_v6 = vld [vmem:[#allocation11] sm:$0xff]  ;;  %v598_v9 = vld [vmem:[%s373_s9] sm:$0xff]  ;;  %v1964_v17 = vmov 1983009808   ;;  %vm580_vm2 = vcmask 64512  }
  0x3f   : > { %452 = vmatpush.msra.mxu0 %v429_v2  ;;  %v599_v7 = vld [vmem:[#allocation12] sm:$0xff]  ;;  %v475_v18 = vunpack.c.l.s4 %v1964_v17  ;;  %v1965_v32 = vmov 1934713408   ;;  %vm585_vm3 = vcmask 7168   ;;  %s1967_s21 = smov 96   ;;  %s1970_s22 = smov 16  }
  0x40   : > { %624 = vmatpush.msra.mxu1 %v601_v3  ;;  %v2144_v8 = vld [vmem:[%s363_s27] sm:$0xff]  ;;  %v499_v33 = vunpack.c.l.s4 %v1965_v32  ;;  %s1971_s24 = smov 24   ;;  %s1972_s14 = smov 8   ;;  %vm1370_vm4 = vcmask 130048   ;;  %vm1372_vm5 = vcmask 195584  }
  0x41   : > { %453 = vmatpush.msra.mxu0 %v428_v4  ;;  %v1709_v10 = vld [vmem:[%s2507_s3] ss:$0 sm:$0xff]  ;;  %v2164_v22 = vunpack.c.0.s8 %v475_v18  ;;  %s1590_s25 = sshll.u32 %s1947_s30, 3  ;;  %s2534_s11 = sld [smem:[#allocation28_spill]] }
  0x42   : > { %625 = vmatpush.msra.mxu1 %v600_v5  ;;  %v1710_v11 = vld [vmem:[%s2509_s5] ss:$0 sm:$0xff]  ;;  %v2181_v41 = vunpack.c.0.s8 %v499_v33  ;;  %s1428_s7 = scalar_lea.hbm %s2512_s8, %s1590_s25  ;;  %s421_s30 = scalar_lea.vmem [#allocation14], %s2122_s13 }
  0x43   : > { %454 = vmatpush.msra.mxu0 %v427_v6  ;;  %s1430_s15 = sshll.u32 %s421_s30, 4  ;;  %s1432_s26 = sshll.u32 %s1428_s7, 4  ;;  %s1431_s15 = int_to_ptr.vmem [resolvable:$true] %s1430_s15  ;;  %s1433_s26 = int_to_ptr.hbm [resolvable:$true] %s1432_s26 }
  0x44   : > { %626 = vmatpush.msra.mxu1 %v599_v7  ;;  %1575 = vmatmul.msk.f32.vlgmr.msra.gmra.mxu0 %vm435_vm0, %v2144_v8  ;;  %s1417_s16 = scalar_lea.sflag [#allocation8], %s2119_s4  ;;  %s1881_s13 = scalar_lea.hbm %s2512_s8, 16 }
  0x45   : > { %1576 = vmatmul.msk.f32.vlgmr.msra.gmra.mxu1 %vm435_vm0, %v598_v9 }
  0xc1   : > { %v456_v12 = vpop.f32.mrf.mxu0 }
  0xc2   : > { %v628_v13 = vpop.f32.mrf.mxu1  ;;  %v457_v14 = vadd.f32 %v1709_v10, %v456_v12 }
  0xc3   : > { %v2155_v15 = vadd.f32 %v1710_v11, %v628_v13 }
  0xc4   : > { %466 = vrot.lane.b32.xlu1 %v457_v14, %s1962_s19  ;;  %460 = vrot.lane.b32.xlu0 %v457_v14, %s1963_s20  ;;  %v472_v39 = vrot.slane %v457_v14, 4 }
  0xc5   : > { %635 = vrot.lane.b32.xlu2 %v2155_v15, %s1961_s18  ;;  %v644_v20 = vrot.slane %v2155_v15, 4 }
  0xcc   : > { %632 = vrot.lane.b32.xlu1 %v2155_v15, %s1963_s20  ;;  %463 = vrot.lane.b32.xlu0 %v457_v14, %s1961_s18  ;;  %s1875_s18 = sshra.s32 %s1433_s26, 4  ;;  %s1876_s18 = int_to_ptr.hbm [resolvable:$true] %s1875_s18 }
  0xcd   : > { %638 = vrot.lane.b32.xlu2 %v2155_v15, %s1962_s19  ;;  %s1877_s19 = scalar_lea.hbm %s1876_s18, 8  ;;  %p1882_p10 = scmp.lt.s32.totalorder %s1876_s18, %s2512_s8 }
  0xce   : > { %p1878_p1 = scmp.ne.s32.totalorder %s1876_s18, %s1877_s19  ;;  %p1883_p11 = scmp.lt.s32.totalorder %s1881_s13, %s1877_s19 }
  0xd0   : > { %p1879_p3 = pnand %p1878_p1, %p2093_p2  ;;  %p1884_p12 = por %p1883_p11, %p1882_p10 }
  0xd2   : > { %p1880_p9 = pneg %p1879_p3 }
  0xd4   : > { %p1885_p13 = pnand %p1884_p12, %p1880_p9 }
 0x11f   : > { %v2160_v16 = vpop.permute.xlu2 %635 }
 0x120   : > { %v641_v19 = vrot.slane %v2160_v16, 4  ;;  %v645_v25 = vsel %vm470_vm1, %v2160_v16, %v644_v20 }
 0x121   : > { %v653_v31 = vperm.slane %v645_v25, %v2164_v22 }
 0x122   : > { %v643_v27 = vsel %vm470_vm1, %v641_v19, %v2155_v15 }
 0x123   : > { %v649_v34 = vperm.slane %v643_v27, %v2164_v22  ;;  %v680_v40 = vrot.slane %v653_v31, 4 }
 0x125   : > { %v668_v45 = vrot.slane %v649_v34, 4 }
 0x127   : > { %v2170_v28 = vpop.permute.xlu2 %638 }
 0x128   : > { %v654_v35 = vrot.slane %v2170_v28, 4 }
 0x136   : > { %v467_v21 = vpop.permute.xlu1 %466  ;;  %v461_v24 = vpop.permute.xlu0 %460 }
 0x137   : > { %v482_v23 = vrot.slane %v467_v21, 4  ;;  %v484_v26 = vrot.slane %v461_v24, 4 }
 0x139   : > { %v483_v29 = vsel %vm470_vm1, %v482_v23, %v461_v24  ;;  %v485_v30 = vsel %vm470_vm1, %v467_v21, %v484_v26 }
 0x13a   : > { %v489_v36 = vperm.slane %v483_v29, %v2164_v22  ;;  %v493_v37 = vperm.slane %v485_v30, %v2164_v22 }
 0x13c   : > { %v494_v49 = vrot.slane %v489_v36, 4  ;;  %v506_v50 = vrot.slane %v493_v37, 4 }
 0x13e   : > { %v2179_v38 = vpop.permute.xlu1 %632  ;;  %v464_v44 = vpop.permute.xlu0 %463 }
 0x13f   : > { %v655_v42 = vsel %vm470_vm1, %v654_v35, %v2179_v38  ;;  %v656_v43 = vrot.slane %v2179_v38, 4  ;;  %v469_v47 = vrot.slane %v464_v44, 4  ;;  %v473_v48 = vsel %vm470_vm1, %v464_v44, %v472_v39 }
 0x140   : > { %v661_v46 = vperm.slane %v655_v42, %v2164_v22  ;;  %v481_v52 = vperm.slane %v473_v48, %v2164_v22 }
 0x141   : > { %v657_v51 = vsel %vm470_vm1, %v2170_v28, %v656_v43  ;;  %v471_v56 = vsel %vm470_vm1, %v469_v47, %v457_v14 }
 0x142   : > { %v665_v53 = vperm.slane %v657_v51, %v2164_v22  ;;  %v666_v54 = vrot.slane %v661_v46, 4  ;;  %v669_v55 = vsel %vm470_vm1, %v661_v46, %v668_v45  ;;  %v477_v58 = vperm.slane %v471_v56, %v2164_v22 }
 0x143   : > { %v677_v57 = vperm.slane %v669_v55, %v2181_v41  ;;  %v507_v59 = vsel %vm470_vm1, %v506_v50, %v481_v52  ;;  %v508_v60 = vrot.slane %v481_v52, 4 }
 0x144   : > { %v667_v61 = vsel %vm470_vm1, %v666_v54, %v649_v34  ;;  %v678_v62 = vrot.slane %v665_v53, 4  ;;  %v681_v63 = vsel %vm470_vm1, %v665_v53, %v680_v40  ;;  %v513_v0 = vperm.slane %v507_v59, %v2181_v41 }
 0x145   : > { %v673_v1 = vperm.slane %v667_v61, %v2181_v41  ;;  %v689_v2 = vperm.slane %v681_v63, %v2181_v41  ;;  %v692_v3 = vrot.slane %v677_v57, 4  ;;  %v495_v4 = vsel %vm470_vm1, %v494_v49, %v477_v58 }
 0x146   : > { %v679_v5 = vsel %vm470_vm1, %v678_v62, %v653_v31  ;;  %v496_v6 = vrot.slane %v477_v58, 4  ;;  %v501_v7 = vperm.slane %v495_v4, %v2181_v41  ;;  %v509_v9 = vsel %vm470_vm1, %v493_v37, %v508_v60 }
 0x147   : > { %v690_v10 = vrot.slane %v673_v1, 4  ;;  %v693_v11 = vsel %vm470_vm1, 0.0, %v692_v3  ;;  %v696_v12 = vrot.slane %v689_v2, 4  ;;  %v517_v13 = vperm.slane %v509_v9, %v2181_v41 }
 0x148   : > { %v703_v14 = vrot.slane %v693_v11, 4  ;;  %v497_v17 = vsel %vm470_vm1, %v489_v36, %v496_v6  ;;  %v518_v18 = vrot.slane %v501_v7, 4  ;;  %v522_v19 = vrot.slane %v513_v0, 4 }
 0x149   : > { %v691_v20 = vsel %vm470_vm1, 0.0, %v690_v10  ;;  %v697_v21 = vsel %vm470_vm1, 0.0, %v696_v12  ;;  %v505_v23 = vperm.slane %v497_v17, %v2181_v41  ;;  %v524_v24 = vrot.slane %v517_v13, 4 }
 0x14a   : > { %v714_v25 = vrot.slane %v697_v21, 4  ;;  %v519_v26 = vsel %vm470_vm1, 0.0, %v518_v18  ;;  %v523_v27 = vsel %vm470_vm1, 0.0, %v522_v19  ;;  %v685_v29 = vperm.slane %v679_v5, %v2181_v41 }
 0x14b   : > { %v520_v30 = vrot.slane %v505_v23, 4  ;;  %v525_v31 = vsel %vm470_vm1, 0.0, %v524_v24  ;;  %v537_v32 = vsel %vm470_vm1, %v524_v24, %v513_v0  ;;  %v698_v33 = vsel %vm470_vm1, %v692_v3, %v673_v1 }
 0x14c   : > { %v541_v34 = vperm.slane %v537_v32, %v2164_v22  ;;  %v542_v35 = vrot.slane %v525_v31, 4  ;;  %v694_v36 = vrot.slane %v685_v29, 4  ;;  %v702_v37 = vperm.slane %v698_v33, %v2164_v22 }
 0x14d   : > { %v521_v39 = vsel %vm470_vm1, 0.0, %v520_v30  ;;  %v526_v40 = vsel %vm470_vm1, %v520_v30, %v501_v7  ;;  %v704_v42 = vsel %vm470_vm1, %v703_v14, %v691_v20  ;;  %v709_v43 = vsel %vm470_vm1, %v696_v12, %v685_v29 }
 0x14e   : > { %v530_v44 = vperm.slane %v526_v40, %v2164_v22  ;;  %v531_v45 = vrot.slane %v521_v39, 4  ;;  %v543_v46 = vsel %vm470_vm1, %v542_v35, %v523_v27  ;;  %v562_v47 = vrot.slane %v541_v34, 4 }
 0x14f   : > { %v547_v48 = vperm.slane %v543_v46, %v2164_v22  ;;  %v695_v49 = vsel %vm470_vm1, 0.0, %v694_v36  ;;  %v708_v50 = vperm.slane %v704_v42, %v2164_v22  ;;  %v713_v51 = vperm.slane %v709_v43, %v2164_v22 }
 0x150   : > { %v532_v52 = vsel %vm470_vm1, %v531_v45, %v519_v26  ;;  %v550_v53 = vrot.slane %v530_v44, 4  ;;  %v715_v54 = vsel %vm470_vm1, %v714_v25, %v695_v49  ;;  %v722_v55 = vrot.slane %v702_v37, 4 }
 0x151   : > { %v536_v56 = vperm.slane %v532_v52, %v2164_v22  ;;  %v560_v57 = vrot.slane %v547_v48, 4  ;;  %v563_v58 = vsel %vm470_vm1, %v547_v48, %v562_v47  ;;  %v719_v59 = vperm.slane %v715_v54, %v2164_v22 }
 0x152   : > { %v571_v60 = vperm.slane %v563_v58, %v2181_v41  ;;  %v720_v61 = vrot.slane %v708_v50, 4  ;;  %v723_v62 = vsel %vm470_vm1, %v708_v50, %v722_v55  ;;  %v734_v63 = vrot.slane %v713_v51, 4 }
 0x153   : > { %v548_v0 = vrot.slane %v536_v56, 4  ;;  %v551_v1 = vsel %vm470_vm1, %v536_v56, %v550_v53  ;;  %v561_v2 = vsel %vm470_vm1, %v560_v57, %v541_v34  ;;  %v732_v3 = vrot.slane %v719_v59, 4 }
 0x154   : > { %v559_v4 = vperm.slane %v551_v1, %v2181_v41  ;;  %v567_v5 = vperm.slane %v561_v2, %v2181_v41  ;;  %v576_v6 = vrot.slane %v571_v60, 4  ;;  %v721_v7 = vsel %vm470_vm1, %v720_v61, %v702_v37 }
 0x155   : > { %v549_v9 = vsel %vm470_vm1, %v548_v0, %v530_v44  ;;  %v727_v10 = vperm.slane %v721_v7, %v2181_v41  ;;  %v733_v11 = vsel %vm470_vm1, %v732_v3, %v713_v51  ;;  %v731_v12 = vperm.slane %v723_v62, %v2181_v41 }
 0x156   : > { %v555_v13 = vperm.slane %v549_v9, %v2181_v41  ;;  %v572_v14 = vrot.slane %v567_v5, 4  ;;  %v577_v17 = vsel %vm470_vm1, %v576_v6, %v559_v4  ;;  %v578_v18 = vrot.slane %v559_v4, 4 }
 0x157   : > { %583 = vst.msk [vmem:[#allocation2 + $0x10] sm:$0xff] %vm580_vm2, %v577_v17  ;;  %v739_v19 = vperm.slane %v733_v11, %v2181_v41  ;;  %v746_v20 = vrot.slane %v727_v10, 4  ;;  %v735_v21 = vsel %vm470_vm1, %v719_v59, %v734_v63  ;;  %v750_v23 = vrot.slane %v731_v12, 4 }
 0x158   : > { %v573_v24 = vsel %vm470_vm1, %v572_v14, %v555_v13  ;;  %v574_v25 = vrot.slane %v555_v13, 4  ;;  %v579_v26 = vsel %vm470_vm1, %v571_v60, %v578_v18  ;;  %v743_v27 = vperm.slane %v735_v21, %v2181_v41 }
 0x159   : > { %581 = vst.msk [vmem:[#allocation2] sm:$0xff] %vm580_vm2, %v573_v24  ;;  %v747_v29 = vsel %vm470_vm1, %v739_v19, %v746_v20  ;;  %v744_v30 = vrot.slane %v739_v19, 4  ;;  %v1966_v45 = vmov -inf   ;;  %v1696_v51 = vpack.i.bf16 %v2179_v38, %v2155_v15 }
 0x15a   : > { %v575_v31 = vsel %vm470_vm1, %v567_v5, %v574_v25  ;;  %584 = vst.msk [vmem:[#allocation2 + $0x18] sm:$0xff] %vm580_vm2, %v579_v26  ;;  %1579 = vmatpush.xpose.msk.msra.mxu3 %vm580_vm2, %v747_v29  ;;  %v751_v32 = vsel %vm470_vm1, %v743_v27, %v750_v23  ;;  %v748_v33 = vrot.slane %v743_v27, 4  ;;  %v1701_v52 = vpack.i.bf16 %v2170_v28, %v2160_v16 }
 0x15b   : > { %582 = vst.msk [vmem:[#allocation2 + $0x8] sm:$0xff] %vm580_vm2, %v575_v31  ;;  %v745_v34 = vsel %vm470_vm1, %v744_v30, %v727_v10  ;;  %v1968_v53 = vmov 0   ;;  %v1969_v54 = vmov 0.0  }
 0x15c   : > { %1577 = vmatpush.xpose.msk.msra.mxu2 %vm580_vm2, %v745_v34  ;;  %v749_v35 = vsel %vm470_vm1, %v748_v33, %v731_v12  ;;  %586 = vst.msk [vmem:[#allocation3] sm:$0xff] %vm585_vm3, %v1966_v45  ;;  %1708 = vset.pattern.permute.xlu1 %v1968_v53 }
 0x15d   : > { %587 = vst.msk [vmem:[#allocation3 + $0x8] sm:$0xff] %vm585_vm3, %v1966_v45  ;;  %1706 = vset.pattern.permute.xlu2 %v1968_v53  ;;  %1707 = vset.pattern.permute.xlu0 %v1968_v53 }
 0x15e   : > { %1583 = vmatpush.xpose.msk.msrb.mxu3 %vm580_vm2, %v751_v32  ;;  %v876_v39 = vld [vmem:[#allocation2 + $0x10] sm:$0xff]  ;;  %588 = vst.msk [vmem:[#allocation3 + $0x10] sm:$0xff] %vm585_vm3, %v1966_v45 }
 0x15f   : > { %589 = vst.msk [vmem:[#allocation3 + $0x18] sm:$0xff] %vm585_vm3, %v1966_v45 }
 0x160   : > { %1581 = vmatpush.xpose.msk.msrb.mxu2 %vm580_vm2, %v749_v35  ;;  %v874_v36 = vld [vmem:[#allocation2] sm:$0xff]  ;;  %592 = vst.msk [vmem:[#allocation4 + $0x10] sm:$0xff] %vm585_vm3, %v1969_v54 }
 0x161   : > { %1578 = vmatmul.msk.f32.vlgmr.msra.gmra.mxu2 %vm580_vm2, %v874_v36  ;;  %v877_v40 = vld [vmem:[#allocation2 + $0x18] sm:$0xff]  ;;  %590 = vst.msk [vmem:[#allocation4] sm:$0xff] %vm585_vm3, %v1969_v54 }
 0x162   : > { %v875_v37 = vld [vmem:[#allocation2 + $0x8] sm:$0xff]  ;;  %591 = vst.msk [vmem:[#allocation4 + $0x8] sm:$0xff] %vm585_vm3, %v1969_v54 }
 0x163   : > { %1580 = vmatmul.msk.f32.vlgmr.msra.gmra.mxu3 %vm580_vm2, %v875_v37  ;;  %593 = vst.msk [vmem:[#allocation4 + $0x18] sm:$0xff] %vm585_vm3, %v1969_v54  ;;  %v2302_v15 = vld [vmem:[#allocation3] sm:$0xff] }
 0x164   : > { %594 = vst.msk [vmem:[#allocation5] sm:$0xff] %vm580_vm2, %v1969_v54  ;;  %v2312_v55 = vld [vmem:[#allocation3 + $0x8] sm:$0xff] }
 0x165   : > { %595 = vst.msk [vmem:[#allocation5 + $0x8] sm:$0xff] %vm580_vm2, %v1969_v54  ;;  %v2314_v56 = vld [vmem:[#allocation3 + $0x10] sm:$0xff] }
 0x166   : > { %596 = vst.msk [vmem:[#allocation5 + $0x10] sm:$0xff] %vm580_vm2, %v1969_v54  ;;  %v2316_v59 = vld [vmem:[#allocation3 + $0x18] sm:$0xff] }
 0x167   : > { %597 = vst.msk [vmem:[#allocation5 + $0x18] sm:$0xff] %vm580_vm2, %v1969_v54 }
 0x169   : > { %1582 = vmatmul.msk.f32.vlgmr.msrb.gmra.mxu2 %vm580_vm2, %v876_v39 }
 0x16b   : > { %1584 = vmatmul.msk.f32.vlgmr.msrb.gmra.mxu3 %vm580_vm2, %v877_v40 }
 0x1e4   : > { %v2270_v42 = vpop.f32.mrf.mxu2 }
 0x1e5   : > { %v987_v43 = vsel %vm580_vm2, %v2270_v42, -inf }
 0x1e6   : > { %v2274_v44 = vpop.f32.mrf.mxu3  ;;  %988 = vmax.xlane.f32.xlu2 %v987_v43 }
 0x1e7   : > { %v990_v47 = vsel %vm580_vm2, %v2274_v44, -inf }
 0x1ec   : > { %v2278_v46 = vpop.f32.mrf.mxu2 }
 0x1ed   : > { %v993_v48 = vsel %vm580_vm2, %v2278_v46, -inf }
 0x1ee   : > { %v2286_v49 = vpop.f32.mrf.mxu3  ;;  %991 = vmax.xlane.f32.xlu2 %v990_v47  ;;  %994 = vmax.xlane.f32.xlu0 %v993_v48 }
 0x1ef   : > { %v996_v50 = vsel %vm580_vm2, %v2286_v49, -inf }
 0x1f0   : > { %997 = vmax.xlane.f32.xlu1 %v996_v50 }
 0x202   : > { %1697 = vrot.lane.b32.xlu0 %v1696_v51, %s1967_s21 }
 0x209   : > { %1702 = vrot.lane.b32.xlu1 %v1701_v52, %s1967_s21 }
 0x259   : > { %v989_v16 = vpop.xlane.xlu2 %988 }
 0x25a   : > { %v2305_v28 = vmax.f32 %v2302_v15, %v989_v16 }
 0x25c   : > { %v1003_v38 = vsub.f32 %v2302_v15, %v2305_v28  ;;  %1204 = vst.msk [vmem:[#allocation3] sm:$0xff] %vm585_vm3, %v2305_v28  ;;  %1017 = vperm.xlu1 %1708, %v2305_v28   ;;  %v1047_v15 = vld [vmem:[#allocation4] sm:$0xff] }
 0x261   : > { %v992_v57 = vpop.xlane.xlu2 %991  ;;  %v995_v58 = vpop.xlane.xlu0 %994 }
 0x262   : > { %v2319_v60 = vmax.f32 %v2312_v55, %v992_v57  ;;  %v2322_v61 = vmax.f32 %v2314_v56, %v995_v58 }
 0x263   : > { %v998_v62 = vpop.xlane.xlu1 %997 }
 0x264   : > { %v1004_v63 = vsub.f32 %v2312_v55, %v2319_v60  ;;  %1205 = vst.msk [vmem:[#allocation3 + $0x8] sm:$0xff] %vm585_vm3, %v2319_v60  ;;  %v1005_v0 = vsub.f32 %v2314_v56, %v2322_v61  ;;  %v2331_v1 = vmax.f32 %v2316_v59, %v998_v62  ;;  %1027 = vperm.xlu2 %1706, %v2322_v61   ;;  %v1007_v56 = vmul.f32 1.442695, %v1003_v38  ;;  %v1048_v55 = vld [vmem:[#allocation4 + $0x8] sm:$0xff] }
 0x265   : > { %1206 = vst.msk [vmem:[#allocation3 + $0x10] sm:$0xff] %vm585_vm3, %v2322_v61 }
 0x266   : > { %v1006_v2 = vsub.f32 %v2316_v59, %v2331_v1  ;;  %1207 = vst.msk [vmem:[#allocation3 + $0x18] sm:$0xff] %vm585_vm3, %v2331_v1  ;;  %1032 = vperm.xlu0 %1707, %v2331_v1   ;;  %v1049_v1 = vld [vmem:[#allocation4 + $0x10] sm:$0xff] }
 0x26c   : > { %1022 = vperm.xlu2 %1706, %v2319_v60  }
 0x274   : > { %v1698_v3 = vpop.permute.xlu0 %1697 }
 0x275   : > { %v1700_v4 = vunpack.i.h.bf16 %v1698_v3  ;;  %v1699_v5 = vunpack.i.l.bf16 %v1698_v3 }
 0x277   : > { %v778_v7 = vrot.slane %v1700_v4, 4  ;;  %v766_v9 = vrot.slane %v1699_v5, 4 }
 0x27b   : > { %v1703_v6 = vpop.permute.xlu1 %1702 }
 0x27c   : > { %v1705_v10 = vunpack.i.h.bf16 %v1703_v6  ;;  %v1704_v11 = vunpack.i.l.bf16 %v1703_v6 }
 0x27e   : > { %v776_v12 = vrot.slane %v1705_v10, 4  ;;  %v764_v13 = vrot.slane %v1704_v11, 4  ;;  %v767_v14 = vsel %vm470_vm1, %v1704_v11, %v766_v9  ;;  %v779_v17 = vsel %vm470_vm1, %v1705_v10, %v778_v7 }
 0x27f   : > { %v775_v18 = vperm.slane %v767_v14, %v2164_v22  ;;  %v787_v19 = vperm.slane %v779_v17, %v2164_v22 }
 0x280   : > { %v765_v20 = vsel %vm470_vm1, %v764_v13, %v1699_v5  ;;  %v777_v21 = vsel %vm470_vm1, %v776_v12, %v1700_v4 }
 0x281   : > { %v771_v23 = vperm.slane %v765_v20, %v2164_v22  ;;  %v783_v24 = vperm.slane %v777_v21, %v2164_v22  ;;  %v800_v25 = vrot.slane %v787_v19, 4  ;;  %v802_v26 = vrot.slane %v775_v18, 4 }
 0x283   : > { %v788_v27 = vrot.slane %v783_v24, 4  ;;  %v790_v29 = vrot.slane %v771_v23, 4  ;;  %v801_v30 = vsel %vm470_vm1, %v800_v25, %v775_v18  ;;  %v803_v31 = vsel %vm470_vm1, %v787_v19, %v802_v26 }
 0x284   : > { %v807_v32 = vperm.slane %v801_v30, %v2181_v41  ;;  %v811_v33 = vperm.slane %v803_v31, %v2181_v41 }
 0x285   : > { %v789_v34 = vsel %vm470_vm1, %v788_v27, %v771_v23  ;;  %v791_v35 = vsel %vm470_vm1, %v783_v24, %v790_v29 }
 0x286   : > { %v795_v36 = vperm.slane %v789_v34, %v2181_v41  ;;  %v799_v37 = vperm.slane %v791_v35, %v2181_v41  ;;  %v816_v39 = vrot.slane %v807_v32, 4  ;;  %v818_v40 = vrot.slane %v811_v33, 4 }
 0x288   : > { %v812_v43 = vrot.slane %v795_v36, 4  ;;  %v814_v45 = vrot.slane %v799_v37, 4  ;;  %v819_v47 = vsel %vm470_vm1, 0.0, %v818_v40  ;;  %v831_v48 = vsel %vm470_vm1, %v818_v40, %v807_v32 }
 0x289   : > { %v836_v50 = vrot.slane %v819_v47, 4  ;;  %v817_v52 = vsel %vm470_vm1, 0.0, %v816_v39  ;;  %v835_v54 = vperm.slane %v831_v48, %v2164_v22 }
 0x28a   : > { %v815_v51 = vsel %vm470_vm1, 0.0, %v814_v45  ;;  %v820_v53 = vsel %vm470_vm1, %v814_v45, %v795_v36  ;;  %v813_v62 = vsel %vm470_vm1, 0.0, %v812_v43 }
 0x28b   : > { %v825_v16 = vrot.slane %v815_v51, 4  ;;  %v824_v57 = vperm.slane %v820_v53, %v2164_v22  ;;  %v837_v58 = vsel %vm470_vm1, %v836_v50, %v817_v52  ;;  %v856_v4 = vrot.slane %v835_v54, 4 }
 0x28c   : > { %v841_v3 = vperm.slane %v837_v58, %v2164_v22 }
 0x28d   : > { %v826_v5 = vsel %vm470_vm1, %v825_v16, %v813_v62  ;;  %v844_v6 = vrot.slane %v824_v57, 4 }
 0x28e   : > { %v830_v7 = vperm.slane %v826_v5, %v2164_v22  ;;  %v857_v9 = vsel %vm470_vm1, %v841_v3, %v856_v4  ;;  %v854_v10 = vrot.slane %v841_v3, 4 }
 0x28f   : > { %v865_v11 = vperm.slane %v857_v9, %v2181_v41  ;;  %v1050_v9 = vld [vmem:[#allocation4 + $0x18] sm:$0xff] }
 0x290   : > { %v845_v12 = vsel %vm470_vm1, %v830_v7, %v844_v6  ;;  %v842_v13 = vrot.slane %v830_v7, 4  ;;  %v855_v14 = vsel %vm470_vm1, %v854_v10, %v835_v54  ;;  %v1011_v54 = vmul.f32 1.442695, %v1005_v0 }
 0x291   : > { %v853_v17 = vperm.slane %v845_v12, %v2181_v41  ;;  %v870_v18 = vrot.slane %v865_v11, 4  ;;  %v861_v19 = vperm.slane %v855_v14, %v2181_v41 }
 0x292   : > { %v843_v20 = vsel %vm470_vm1, %v842_v13, %v824_v57  ;;  %v1009_v57 = vmul.f32 1.442695, %v1004_v63 }
 0x293   : > { %v871_v21 = vsel %vm470_vm1, %v870_v18, %v853_v17  ;;  %v849_v23 = vperm.slane %v843_v20, %v2181_v41  ;;  %v866_v24 = vrot.slane %v861_v19, 4  ;;  %v872_v25 = vrot.slane %v853_v17, 4  ;;  %v1076_v17 = vld [vmem:[#allocation5] sm:$0xff] }
 0x294   : > { %1168 = vmatpush.msra.mxu2 %v871_v21 }
 0x295   : > { %v867_v26 = vsel %vm470_vm1, %v866_v24, %v849_v23  ;;  %v873_v27 = vsel %vm470_vm1, %v865_v11, %v872_v25  ;;  %v868_v29 = vrot.slane %v849_v23, 4 }
 0x296   : > { %1122 = vmatpush.msrb.mxu0 %v867_v26  ;;  %1191 = vmatpush.msra.mxu3 %v873_v27 }
 0x297   : > { %v869_v30 = vsel %vm470_vm1, %v861_v19, %v868_v29  ;;  %v1078_v19 = vld [vmem:[#allocation5 + $0x10] sm:$0xff]  ;;  %v1079_v29 = vld [vmem:[#allocation5 + $0x18] sm:$0xff] }
 0x298   : > { %1145 = vmatpush.msrb.mxu1 %v869_v30 }
 0x2be   : > { %v1028_v31 = vpop.permute.xlu2 %1027 }
 0x2bf   : > { %v1037_v32 = vsub.f32 %v2278_v46, %v1028_v31 }
 0x2c1   : > { %v1043_v33 = vmul.f32 1.442695, %v1037_v32 }
 0x2c3   : > { %1713 = vpow2.f32 %v1043_v33 }
 0x2c6   : > { %v1023_v34 = vpop.permute.xlu2 %1022 }
 0x2c7   : > { %v1036_v35 = vsub.f32 %v2274_v44, %v1023_v34 }
 0x2c9   : > { %v1714_v36 = vpop.eup %1713  ;;  %v1041_v37 = vmul.f32 1.442695, %v1036_v35  ;;  %v1077_v35 = vld [vmem:[#allocation5 + $0x8] sm:$0xff] }
 0x2ca   : > { %1587 = vmatmul.msk.f32.vlgmr.msra.gmra.mxu2 %vm580_vm2, %v1714_v36  ;;  %v1061_v39 = vsel %vm580_vm2, %v1714_v36, 0.0 }
 0x2cb   : > { %1715 = vpow2.f32 %v1041_v37  ;;  %1062 = vadd.xlane.f32.xlu1 %v1061_v39 }
 0x2ce   : > { %v1018_v40 = vpop.permute.xlu1 %1017 }
 0x2cf   : > { %v1035_v43 = vsub.f32 %v2270_v42, %v1018_v40  ;;  %v1013_v42 = vmul.f32 1.442695, %v1006_v2 }
 0x2d1   : > { %v1716_v45 = vpop.eup %1715  ;;  %v1039_v47 = vmul.f32 1.442695, %v1035_v43 }
 0x2d2   : > { %1586 = vmatmul.msk.f32.vlgmr.msrb.gmra.mxu1 %vm580_vm2, %v1716_v45  ;;  %v1058_v46 = vsel %vm580_vm2, %v1716_v45, 0.0 }
 0x2d3   : > { %1717 = vpow2.f32 %v1039_v47  ;;  %1059 = vadd.xlane.f32.xlu1 %v1058_v46 }
 0x2d8   : > { %v1033_v44 = vpop.permute.xlu0 %1032 }
 0x2d9   : > { %v1718_v48 = vpop.eup %1717  ;;  %v1038_v50 = vsub.f32 %v2286_v49, %v1033_v44 }
 0x2da   : > { %1585 = vmatmul.msk.f32.vlgmr.msrb.gmra.mxu0 %vm580_vm2, %v1718_v48  ;;  %v1055_v51 = vsel %vm580_vm2, %v1718_v48, 0.0 }
 0x2db   : > { %v1045_v52 = vmul.f32 1.442695, %v1038_v50  ;;  %1056 = vadd.xlane.f32.xlu0 %v1055_v51 }
 0x2dd   : > { %1719 = vpow2.f32 %v1045_v52 }
 0x2de   : > { %1721 = vpow2.f32 %v1013_v42 }
 0x2df   : > { %1723 = vpow2.f32 %v1011_v54 }
 0x2e0   : > { %1725 = vpow2.f32 %v1009_v57 }
 0x2e1   : > { %1727 = vpow2.f32 %v1007_v56 }
 0x2e3   : > { %v1720_v53 = vpop.eup %1719 }
 0x2e4   : > { %1588 = vmatmul.msk.f32.vlgmr.msra.gmra.mxu3 %vm580_vm2, %v1720_v53  ;;  %v1064_v49 = vsel %vm580_vm2, %v1720_v53, 0.0  ;;  %v1722_v16 = vpop.eup %1721 }
 0x2e5   : > { %1065 = vadd.xlane.f32.xlu2 %v1064_v49  ;;  %v1724_v59 = vpop.eup %1723  ;;  %v1054_v11 = vmul.f32 %v1722_v16, %v1050_v9 }
 0x2e6   : > { %v1726_v61 = vpop.eup %1725  ;;  %v1053_v2 = vmul.f32 %v1724_v59, %v1049_v1 }
 0x2e7   : > { %v1728_v0 = vpop.eup %1727  ;;  %v1052_v60 = vmul.f32 %v1726_v61, %v1048_v55 }
 0x2e8   : > { %v1051_v28 = vmul.f32 %v1728_v0, %v1047_v15 }
 0x2ec   : > { %1097 = vperm.xlu1 %1708, %v1722_v16  }
 0x2ef   : > { %1092 = vperm.xlu0 %1707, %v1724_v59  }
 0x2f7   : > { %1087 = vperm.xlu0 %1707, %v1726_v61  }
 0x2fd   : > { %1082 = vperm.xlu2 %1706, %v1728_v0  }
 0x33e   : > { %v1063_v58 = vpop.xlane.xlu1 %1062 }
 0x33f   : > { %v1069_v62 = vadd.f32 %v1063_v58, %v1053_v2 }
 0x341   : > { %1074 = vst.msk [vmem:[#allocation4 + $0x10] sm:$0xff] %vm585_vm3, %v1069_v62 }
 0x346   : > { %v1060_v63 = vpop.xlane.xlu1 %1059 }
 0x347   : > { %v1068_v3 = vadd.f32 %v1060_v63, %v1052_v60 }
 0x348   : > { %v1213_v4 = vld [vmem:[#allocation4 + $0x10] sm:$0xff] }
 0x349   : > { %1073 = vst.msk [vmem:[#allocation4 + $0x8] sm:$0xff] %vm585_vm3, %v1068_v3  ;;  %1729 = vrcp.f32 %v1213_v4 }
 0x34d   : > { %v1170_v27 = vpop.f32.mrf.mxu2 }
 0x34e   : > { %v1057_v38 = vpop.xlane.xlu0 %1056 }
 0x34f   : > { %v1730_v5 = vpop.eup %1729  ;;  %v1067_v6 = vadd.f32 %v1057_v38, %v1051_v28  ;;  %v1147_v43 = vpop.f32.mrf.mxu1 }
 0x350   : > { %1235 = vperm.xlu2 %1706, %v1730_v5   ;;  %v1212_v7 = vld [vmem:[#allocation4 + $0x8] sm:$0xff] }
 0x351   : > { %1072 = vst.msk [vmem:[#allocation4] sm:$0xff] %vm585_vm3, %v1067_v6  ;;  %1731 = vrcp.f32 %v1212_v7 }
 0x357   : > { %v1732_v10 = vpop.eup %1731  ;;  %v1124_v24 = vpop.f32.mrf.mxu0 }
 0x358   : > { %1230 = vperm.xlu2 %1706, %v1732_v10   ;;  %v1066_v12 = vpop.xlane.xlu2 %1065  ;;  %v1211_v13 = vld [vmem:[#allocation4] sm:$0xff] }
 0x359   : > { %v1070_v14 = vadd.f32 %v1066_v12, %v1054_v11  ;;  %1733 = vrcp.f32 %v1211_v13 }
 0x35b   : > { %1075 = vst.msk [vmem:[#allocation4 + $0x18] sm:$0xff] %vm585_vm3, %v1070_v14 }
 0x35e   : > { %v1098_v30 = vpop.permute.xlu1 %1097 }
 0x35f   : > { %v1734_v18 = vpop.eup %1733  ;;  %v1103_v33 = vmul.f32 %v1098_v30, %v1079_v29 }
 0x360   : > { %v1083_v20 = vpop.permute.xlu2 %1082  ;;  %1225 = vperm.xlu0 %1707, %v1734_v18  }
 0x361   : > { %v1100_v21 = vmul.f32 %v1083_v20, %v1076_v17  ;;  %v1093_v23 = vpop.permute.xlu0 %1092 }
 0x362   : > { %v1102_v25 = vmul.f32 %v1093_v23, %v1078_v19  ;;  %v1214_v26 = vld [vmem:[#allocation4 + $0x18] sm:$0xff] }
 0x363   : > { %v1196_v31 = vadd.f32 %v1124_v24, %v1100_v21  ;;  %1735 = vrcp.f32 %v1214_v26 }
 0x364   : > { %v1198_v32 = vadd.f32 %v1170_v27, %v1102_v25 }
 0x365   : > { %1200 = vst.msk [vmem:[#allocation5] sm:$0xff] %vm580_vm2, %v1196_v31 }
 0x366   : > { %1202 = vst.msk [vmem:[#allocation5 + $0x10] sm:$0xff] %vm580_vm2, %v1198_v32 }
 0x367   : > { %v1193_v34 = vpop.f32.mrf.mxu3 }
 0x368   : > { %v1199_v36 = vadd.f32 %v1193_v34, %v1103_v33 }
 0x369   : > { %v1736_v37 = vpop.eup %1735  ;;  %v1088_v39 = vpop.permute.xlu0 %1087 }
 0x36a   : > { %1203 = vst.msk [vmem:[#allocation5 + $0x18] sm:$0xff] %vm580_vm2, %v1199_v36  ;;  %v1101_v40 = vmul.f32 %v1088_v39, %v1077_v35  ;;  %1240 = vperm.xlu1 %1708, %v1736_v37  }
 0x36c   : > { %v1197_v45 = vadd.f32 %v1147_v43, %v1101_v40  ;;  %v1219_v44 = vld [vmem:[#allocation5] sm:$0xff] }
 0x36d   : > { %v1221_v50 = vld [vmem:[#allocation5 + $0x10] sm:$0xff] }
 0x36e   : > { %1201 = vst.msk [vmem:[#allocation5 + $0x8] sm:$0xff] %vm580_vm2, %v1197_v45 }
 0x371   : > { %v1222_v61 = vld [vmem:[#allocation5 + $0x18] sm:$0xff] }
 0x375   : > { %v1220_v53 = vld [vmem:[#allocation5 + $0x8] sm:$0xff] }
 0x3aa   : > { %v1236_v47 = vpop.permute.xlu2 %1235 }
 0x3ab   : > { %v1245_v51 = vmul.f32 %v1236_v47, %v1221_v50 }
 0x3ad   : > { %v1247_v54 = vrot.slane %v1245_v51, 4 }
 0x3b2   : > { %v1231_v42 = vpop.permute.xlu2 %1230 }
 0x3b3   : > { %v1244_v49 = vmul.f32 %v1231_v42, %v1220_v53 }
 0x3b5   : > { %v1261_v0 = vrot.slane %v1244_v49, 4 }
 0x3d2   : > { %v1226_v46 = vpop.permute.xlu0 %1225 }
 0x3d3   : > { %v1243_v48 = vmul.f32 %v1226_v46, %v1219_v44 }
 0x3d5   : > { %v1249_v52 = vrot.slane %v1243_v48, 4  ;;  %v1248_v57 = vsel %vm470_vm1, %v1247_v54, %v1243_v48 }
 0x3d6   : > { %v1254_v2 = vperm.slane %v1248_v57, %v2164_v22 }
 0x3d7   : > { %v1250_v16 = vsel %vm470_vm1, %v1245_v51, %v1249_v52 }
 0x3d8   : > { %v1258_v59 = vperm.slane %v1250_v16, %v2164_v22  ;;  %v1273_v3 = vrot.slane %v1254_v2, 4 }
 0x3da   : > { %v1285_v55 = vrot.slane %v1258_v59, 4 }
 0x3dc   : > { %v1241_v56 = vpop.permute.xlu1 %1240 }
 0x3dd   : > { %v1246_v1 = vmul.f32 %v1241_v56, %v1222_v61 }
 0x3df   : > { %v1259_v58 = vrot.slane %v1246_v1, 4  ;;  %v1262_v62 = vsel %vm470_vm1, %v1246_v1, %v1261_v0 }
 0x3e0   : > { %v1270_v60 = vperm.slane %v1262_v62, %v2164_v22 }
 0x3e1   : > { %v1260_v63 = vsel %vm470_vm1, %v1259_v58, %v1244_v49  ;;  %v1973_v58 = vmov 32.0  }
 0x3e2   : > { %v1266_v4 = vperm.slane %v1260_v63, %v2164_v22  ;;  %v1283_v15 = vrot.slane %v1270_v60, 4  ;;  %v1286_v28 = vsel %vm470_vm1, %v1270_v60, %v1285_v55  ;;  %1737 = vrcp.f32 %v1973_v58 }
 0x3e3   : > { %v1294_v38 = vperm.slane %v1286_v28, %v2181_v41 }
 0x3e4   : > { %v1271_v5 = vrot.slane %v1266_v4, 4  ;;  %v1274_v6 = vsel %vm470_vm1, %v1266_v4, %v1273_v3  ;;  %v1284_v7 = vsel %vm470_vm1, %v1283_v15, %v1258_v59 }
 0x3e5   : > { %v1282_v9 = vperm.slane %v1274_v6, %v2181_v41  ;;  %v1290_v10 = vperm.slane %v1284_v7, %v2181_v41  ;;  %v1301_v11 = vrot.slane %v1294_v38, 4 }
 0x3e6   : > { %v1272_v12 = vsel %vm470_vm1, %v1271_v5, %v1254_v2 }
 0x3e7   : > { %v1278_v13 = vperm.slane %v1272_v12, %v2181_v41  ;;  %v1297_v14 = vrot.slane %v1282_v9, 4  ;;  %v1299_v17 = vrot.slane %v1290_v10, 4  ;;  %v1302_v18 = vsel %vm470_vm1, 0.0, %v1301_v11 }
 0x3e8   : > { %v1314_v19 = vsel %vm470_vm1, %v1301_v11, %v1290_v10  ;;  %v1319_v20 = vrot.slane %v1302_v18, 4  ;;  %v1738_v62 = vpop.eup %1737  ;;  %v1711_v18 = vld [vmem:[%s2510_s6] ss:$0 sm:$0xff] }
 0x3e9   : > { %v1298_v21 = vsel %vm470_vm1, 0.0, %v1297_v14  ;;  %v1295_v23 = vrot.slane %v1278_v13, 4  ;;  %v1300_v24 = vsel %vm470_vm1, 0.0, %v1299_v17  ;;  %v1303_v25 = vsel %vm470_vm1, %v1297_v14, %v1278_v13 }
 0x3ea   : > { %v1308_v26 = vrot.slane %v1298_v21, 4  ;;  %v1307_v27 = vperm.slane %v1303_v25, %v2164_v22  ;;  %v1318_v29 = vperm.slane %v1314_v19, %v2164_v22  ;;  %v1320_v30 = vsel %vm470_vm1, %v1319_v20, %v1300_v24  ;;  %v1712_v21 = vld [vmem:[%s2534_s11] ss:$0 sm:$0xff] }
 0x3eb   : > { %v1296_v31 = vsel %vm470_vm1, 0.0, %v1295_v23  ;;  %v1324_v32 = vperm.slane %v1320_v30, %v2164_v22  ;;  %v1380_v55 = vmul.f32 32.0, %v1738_v62  ;;  %vm1384_vm6 = vweird.f32 %v1738_v62 }
 0x3ec   : > { %v1309_v33 = vsel %vm470_vm1, %v1308_v26, %v1296_v31  ;;  %v1327_v34 = vrot.slane %v1307_v27, 4  ;;  %v1339_v35 = vrot.slane %v1318_v29, 4 }
 0x3ed   : > { %v1313_v36 = vperm.slane %v1309_v33, %v2164_v22  ;;  %v1337_v37 = vrot.slane %v1324_v32, 4  ;;  %v1381_v60 = vsub.f32 1.0, %v1380_v55 }
 0x3ee   : > { %v1340_v39 = vsel %vm470_vm1, %v1324_v32, %v1339_v35 }
 0x3ef   : > { %v1328_v40 = vsel %vm470_vm1, %v1313_v36, %v1327_v34  ;;  %v1348_v43 = vperm.slane %v1340_v39, %v2181_v41  ;;  %v1325_v45 = vrot.slane %v1313_v36, 4  ;;  %v1338_v47 = vsel %vm470_vm1, %v1337_v37, %v1318_v29 }
 0x3f0   : > { %v1336_v46 = vperm.slane %v1328_v40, %v2181_v41  ;;  %v1344_v44 = vperm.slane %v1338_v47, %v2181_v41  ;;  %v1382_v63 = vmul.f32 %v1738_v62, %v1381_v60 }
 0x3f1   : > { %v1353_v48 = vrot.slane %v1348_v43, 4  ;;  %v1326_v50 = vsel %vm470_vm1, %v1325_v45, %v1307_v27 }
 0x3f2   : > { %v1355_v51 = vrot.slane %v1336_v46, 4  ;;  %v1332_v22 = vperm.slane %v1326_v50, %v2181_v41  ;;  %v1349_v52 = vrot.slane %v1344_v44, 4  ;;  %v1383_v3 = vadd.f32 %v1738_v62, %v1382_v63 }
 0x3f3   : > { %v1354_v42 = vsel %vm470_vm1, %v1353_v48, %v1336_v46 }
 0x3f4   : > { %1362 = vrot.lane.b32.xlu1 %v1354_v42, %s1970_s22  ;;  %v1356_v53 = vsel %vm470_vm1, %v1348_v43, %v1355_v51  ;;  %v1351_v54 = vrot.slane %v1332_v22, 4  ;;  %v1350_v49 = vsel %vm470_vm1, %v1349_v52, %v1332_v22  ;;  %v1385_v4 = vsel %vm1384_vm6, %v1738_v62, %v1383_v3 }
 0x3f5   : > { %1366 = vrot.lane.b32.xlu2 %v1356_v53, %s1971_s24 }
 0x3f6   : > { %v1352_v16 = vsel %vm470_vm1, %v1344_v44, %v1351_v54 }
 0x3f7   : > { %1358 = vrot.lane.b32.xlu0 %v1352_v16, %s1972_s14 }
 0x44f   : > { %v1367_v56 = vpop.permute.xlu2 %1366 }
 0x466   : > { %v1363_v41 = vpop.permute.xlu1 %1362 }
 0x469   : > { %v1359_v57 = vpop.permute.xlu0 %1358 }
 0x46a   : > { %v1369_v59 = vsel %vm580_vm2, %v1350_v49, %v1359_v57 }
 0x46b   : > { %v1371_v61 = vsel %vm1370_vm4, %v1369_v59, %v1363_v41 }
 0x46c   : > { %v1373_v0 = vsel %vm1372_vm5, %v1371_v61, %v1367_v56 }
 0x46d   : > { %v1375_v1 = vadd.f32 %v1373_v0, %v2144_v8 }
 0x46f   : > { %v1376_v2 = vsel %vm435_vm0, %v1375_v1, 0.0 }
 0x470   : > { %1377 = vadd.xlane.f32.xlu0 %v1376_v2 }
 0x4e3   : > { %v1378_v15 = vpop.xlane.xlu0 %1377 }
 0x4e4   : > { %v1386_v28 = vmul.f32 %v1385_v4, %v1378_v15 }
 0x4e6   : > { %v1387_v38 = vsub.f32 %v1375_v1, %v1386_v28 }
 0x4e8   : > { %v1388_v5 = vmul.f32 %v1387_v38, %v1387_v38 }
 0x4ea   : > { %v1389_v6 = vsel %vm435_vm0, %v1388_v5, 0.0 }
 0x4eb   : > { %1390 = vadd.xlane.f32.xlu1 %v1389_v6 }
 0x55e   : > { %v1391_v8 = vpop.xlane.xlu1 %1390 }
 0x55f   : > { %v1392_v7 = vmul.f32 %v1391_v8, %v1385_v4 }
 0x561   : > { %v1393_v9 = vadd.f32 1e-05, %v1392_v7 }
 0x563   : > { %1739 = vrsqrt.f32 %v1393_v9  ;;  %vm1400_vm8 = vweird.f32 %v1393_v9 }
 0x569   : > { %v1740_v10 = vpop.eup %1739 }
 0x56a   : > { %v1395_v11 = vmul.f32 %v1740_v10, %v1393_v9  ;;  %vm1401_vm7 = vweird.f32 %v1740_v10 }
 0x56b   : > { %vm1402_vm9 = vmor %vm1400_vm8, %vm1401_vm7 }
 0x56c   : > { %v1396_v12 = vmul.f32 %v1740_v10, %v1395_v11 }
 0x56e   : > { %v1397_v13 = vmul.f32 0.5, %v1396_v12 }
 0x570   : > { %v1398_v14 = vsub.f32 1.5, %v1397_v13 }
 0x572   : > { %v1399_v17 = vmul.f32 %v1740_v10, %v1398_v14 }
 0x574   : > { %v1403_v19 = vsel %vm1402_vm9, %v1740_v10, %v1399_v17 }
 0x575   : > { %v1404_v20 = vmul.f32 %v1403_v19, %v1387_v38 }
 0x577   : > { %v1409_v23 = vmul.f32 %v1711_v18, %v1404_v20 }
 0x579   : > { %v1414_v24 = vadd.f32 %v1712_v21, %v1409_v23 }
 0x57b   : > { %1415 = vst.msk [vmem:[%s421_s30] sm:$0xff] %vm435_vm0, %v1414_v24 }
 0x57c   : > { %1888 = shalt.err (!%p1885_p13)
}
 0x57d   : > { %1605 = dma.vmem_to_hbm [thread:$0]  (%p2093_p2), %s1431_s15, 128, %s1433_s26, %s1417_s16  }
 0x57e PF: > { %s2535_s4 = sld [smem:[#allocation20_spill]]  ;;  %p1622_p0 = pnand %p1564_p6, %p2100_p5 }
 0x580   : > { %p1623_p4 = pneg %p1622_p0 }
 0x584   : > { %s1444_s25 = sand.u32 1, %s2535_s4  }
 0x585   : > { %s1445_s12 = scalar_lea.sflag [#allocation8], %s1444_s25 }
 0x586   : > { %1930 = dma.done.wait (%p1623_p4), %s1445_s12, 128  }
 0x587   : > { %1932 = vsyncadd (%p1623_p4), %s1445_s12, 4294967168  ;;  %s28_s10 = sadd.s32 1, %s1955_s10   ;;  %s2537_s23 = sld [smem:[#allocation21_spill]] }
 0x588   : > { %p25_p7 = scmp.ge.s32.totalorder %s28_s10, 4   ;;  %s2538_s29 = sld [smem:[#allocation24_spill]] }
 0x589   : > { %s2539_s30 = sld [smem:[#allocation22_spill]]  ;;  %s2541_s27 = smov %s1939_s28 }
 0x58a   : > { %s2540_s9 = sld [smem:[#allocation23_spill]]  ;;  %27 = sbr.rel (!%p25_p7) target bundleno = 13 (0xd), region = 126 }
 0x58d   : > { %s2542_s28 = smov %s2537_s23 }
 0x58f   :  { %1451 = vsyncpa [#allocation7], 1 }
 0x590   :  { %1453 = vsyncpa [#allocation7 + $0x1], 1 }
 0x591   :  { %1454 = vsyncpa [#allocation10], 1 }
 0x592   :  { %1456 = vsyncpa [#allocation10 + $0x1], 1 }
 0x593   :  { %1457 = vsyncpa [#allocation13], 1 }
 0x594   :  { %1458 = vsyncpa [#allocation8], 1 }
 0x595   :  { %1460 = vsyncpa [#allocation8 + $0x1], 1 }

</bundles_post_ra>
